<compile_context>
chip_gen: v7x
topology: tpu7x:2x2x1
jax: 0.10.0
libtpu: 0.0.40
codegen_flags: <defaults>
</compile_context>

<pallas_src>
import functools

import jax
import jax.numpy as jnp
from jax.experimental import pallas as pl
from jax.experimental.pallas import tpu as pltpu


def _round_up(a, m):
    return ((a + m - 1) // m) * m


def _time_feature_kernel(x_ref, w_ref, b_ref, out_ref, *, feat, k_in, pack):
    """One tile of packed rows: out = Linear(x[:, 4:]) for `pack` tokens per row.

    x_ref:   (tm, pack*feat)   float32  (pack tokens per row, feat columns each)
    w_ref:   (k_in*pack, C)    float32  (row c*pack+j = weight col c for token
                                         group j, masked to its lane group)
    b_ref:   (1, C)            float32  (bias tiled pack times)
    out_ref: (tm, C)           C = pack*d_model (lane-dense when pack>1)
    """
    x = x_ref[...]
    w = w_ref[...]
    acc = None
    # Small static unroll (pack*k_in <= 8): pure VPU broadcast-FMAs, exact f32.
    for j in range(pack):
        for c in range(k_in):
            col = j * feat + 4 + c
            xc = x[:, col:col + 1]                              # (tm, 1)
            term = xc * w[c * pack + j:c * pack + j + 1, :]     # (tm, C)
            acc = term if acc is None else acc + term
    out_ref[...] = (acc + b_ref[...]).astype(out_ref.dtype)


def time_feature_embedding(x, weight, bias, *, out_dtype=jnp.float32,
                           target_tile_bytes=4 * 1024 * 1024, max_tile_rows=2048):
    """x: (B, L, F) float32, weight: (d_model, K), bias: (d_model,) ->
    (B, L, d_model).  Equivalent to nn.Linear(K, d_model)(x[:, :, 4:])."""
    B, L, F = x.shape
    d_model, k_in = weight.shape
    assert F == 4 + k_in, (
        "forward is x[:, :, 4:] -> Linear(K, d_model); need F == 4 + K "
        f"(got F={F}, K={k_in})")

    N = B * L

    # Lane-packing factor: pack P tokens per 128-lane output row when d_model
    # divides 128 (and N is a multiple of P), so every output store is dense.
    if d_model < 128 and 128 % d_model == 0 and N % (128 // d_model) == 0:
        pack = 128 // d_model
    else:
        pack = 1

    R = N // pack            # packed rows
    C = pack * d_model       # output lanes per packed row
    CF = pack * F            # input lanes per packed row

    # Free, contiguous reshapes — no padding, no extra HBM pass.
    x2d = x.reshape(R, CF).astype(jnp.float32)

    w_t = weight.astype(jnp.float32).T                      # (K, d_model)
    eye = jnp.eye(pack, dtype=jnp.float32)
    # Row c*pack + j: weight column c, placed in lane group j, zero elsewhere.
    w_packed = jnp.concatenate(
        [jnp.kron(eye, w_t[c:c + 1, :]) for c in range(k_in)], axis=0)  # (K*P, C)
    b_packed = jnp.tile(bias.astype(jnp.float32).reshape(1, d_model), (1, pack))  # (1, C)

    # Row tile: aim for ~target_tile_bytes per output buffer, multiple of 8,
    # capped so the grid has >= 2 tiles (both v7x TensorCores busy); a single
    # full block (any row count) when the whole problem is smaller than that.
    out_itemsize = jnp.dtype(out_dtype).itemsize
    tm = max(8, (target_tile_bytes // max(1, C * out_itemsize)) // 8 * 8)
    tm = min(tm, max_tile_rows)
    tm = min(tm, _round_up(pl.cdiv(R, 2), 8))
    if tm >= R:
        tm = R
    grid_m = pl.cdiv(R, tm)   # ragged last block is masked by Pallas

    # Explicit VMEM budget (double-buffered in/out tiles + resident params),
    # generous headroom but well under v7x's 64 MiB physical VMEM.
    in_lane = _round_up(CF, 128)
    out_lane = _round_up(C, 128)
    vmem_need = (2 * tm * (in_lane * 4 + out_lane * out_itemsize)
                 + 4 * (k_in * pack * C + C) * 4)
    vmem_limit = int(min(max(2 * vmem_need, 16 * 1024 * 1024), 32 * 1024 * 1024))

    cost = pl.CostEstimate(
        flops=2 * N * k_in * d_model,
        transcendentals=0,
        bytes_accessed=N * F * 4 + N * d_model * out_itemsize
                       + (k_in * pack * C + C) * 4,
    )

    kernel = functools.partial(_time_feature_kernel, feat=F, k_in=k_in, pack=pack)

    out = pl.pallas_call(
        kernel,
        out_shape=jax.ShapeDtypeStruct((R, C), out_dtype),
        grid=(grid_m,),
        in_specs=[
            pl.BlockSpec((tm, CF), lambda i: (i, 0)),            # streamed rows
            pl.BlockSpec((k_in * pack, C), lambda i: (0, 0)),    # resident weight
            pl.BlockSpec((1, C), lambda i: (0, 0)),              # resident bias
        ],
        out_specs=pl.BlockSpec((tm, C), lambda i: (i, 0)),
        compiler_params=pltpu.CompilerParams(
            dimension_semantics=("parallel",),                   # v7x megacore sharding
            vmem_limit_bytes=vmem_limit,
        ),
        cost_estimate=cost,
    )(x2d, w_packed, b_packed)

    # (R, pack*d_model) row-major is exactly token-major: free reshape back.
    return out.reshape(B, L, d_model)


if __name__ == "__main__":
    B, L, F, d_model = 2, 8, 6, 32

    key = jax.random.PRNGKey(0)
    kx, kw, kb = jax.random.split(key, 3)
    x = jax.random.normal(kx, (B, L, F), dtype=jnp.float32)

    # nn.Linear(2, d_model)-style parameters: U(-1/sqrt(2), 1/sqrt(2)).
    bound = 1.0 / jnp.sqrt(2.0)
    weight = jax.random.uniform(kw, (d_model, 2), jnp.float32, -bound, bound)
    bias = jax.random.uniform(kb, (d_model,), jnp.float32, -bound, bound)

    out = time_feature_embedding(x, weight, bias)
    out = jax.block_until_ready(out)

    # Reference: same math as the PyTorch forward.
    ref = x[:, :, 4:6] @ weight.T + bias

    assert out.shape == (B, L, d_model)
    assert out.dtype == jnp.float32
    assert jnp.allclose(out, ref, atol=1e-5, rtol=1e-5), "mismatch vs reference"

    print("KERNEL_OK")
</pallas_src>

<mosaic_0001>
module attributes {stable_mosaic.version = 11 : i64} {
  func.func @_time_feature_kernel(%arg0: i32, %arg1: memref<4x24xf32, #tpu.memory_space<vmem>>, %arg2: memref<8x128xf32, #tpu.memory_space<vmem>>, %arg3: memref<1x128xf32, #tpu.memory_space<vmem>>, %arg4: memref<4x128xf32, #tpu.memory_space<vmem>>) attributes {dimension_semantics = [#tpu.dimension_semantics<parallel>], iteration_bounds = array<i64: 1>, scalar_prefetch = 0 : i64, scratch_operands = 0 : i64, tpu.core_type = #tpu.core_type<tc>, window_params = [{transform_indices = @transform_0, window_bounds = array<i64: 4, 24>}, {pipeline_mode = #tpu.pipeline_mode<synchronous>, transform_indices = @transform_1, window_bounds = array<i64: 8, 128>}, {pipeline_mode = #tpu.pipeline_mode<synchronous>, transform_indices = @transform_2, window_bounds = array<i64: 1, 128>}, {transform_indices = @transform_3, window_bounds = array<i64: 4, 128>}]} {
    %c0 = arith.constant 0 : index
    %c0_0 = arith.constant 0 : index
    %0 = vector.load %arg1[%c0, %c0_0] : memref<4x24xf32, #tpu.memory_space<vmem>>, vector<4x24xf32>
    %c0_1 = arith.constant 0 : index
    %c0_2 = arith.constant 0 : index
    %1 = vector.load %arg2[%c0_1, %c0_2] : memref<8x128xf32, #tpu.memory_space<vmem>>, vector<8x128xf32>
    %2 = vector.extract_strided_slice %0 {offsets = [0, 4], sizes = [4, 1], strides = [1, 1]} : vector<4x24xf32> to vector<4x1xf32>
    %3 = vector.extract_strided_slice %1 {offsets = [0, 0], sizes = [1, 128], strides = [1, 1]} : vector<8x128xf32> to vector<1x128xf32>
    %4 = vector.broadcast %2 : vector<4x1xf32> to vector<4x128xf32>
    %5 = vector.broadcast %3 : vector<1x128xf32> to vector<4x128xf32>
    %6 = arith.mulf %4, %5 : vector<4x128xf32>
    %7 = vector.extract_strided_slice %0 {offsets = [0, 5], sizes = [4, 1], strides = [1, 1]} : vector<4x24xf32> to vector<4x1xf32>
    %8 = vector.extract_strided_slice %1 {offsets = [4, 0], sizes = [1, 128], strides = [1, 1]} : vector<8x128xf32> to vector<1x128xf32>
    %9 = vector.broadcast %7 : vector<4x1xf32> to vector<4x128xf32>
    %10 = vector.broadcast %8 : vector<1x128xf32> to vector<4x128xf32>
    %11 = arith.mulf %9, %10 : vector<4x128xf32>
    %12 = arith.addf %6, %11 : vector<4x128xf32>
    %13 = vector.extract_strided_slice %0 {offsets = [0, 10], sizes = [4, 1], strides = [1, 1]} : vector<4x24xf32> to vector<4x1xf32>
    %14 = vector.extract_strided_slice %1 {offsets = [1, 0], sizes = [1, 128], strides = [1, 1]} : vector<8x128xf32> to vector<1x128xf32>
    %15 = vector.broadcast %13 : vector<4x1xf32> to vector<4x128xf32>
    %16 = vector.broadcast %14 : vector<1x128xf32> to vector<4x128xf32>
    %17 = arith.mulf %15, %16 : vector<4x128xf32>
    %18 = arith.addf %12, %17 : vector<4x128xf32>
    %19 = vector.extract_strided_slice %0 {offsets = [0, 11], sizes = [4, 1], strides = [1, 1]} : vector<4x24xf32> to vector<4x1xf32>
    %20 = vector.extract_strided_slice %1 {offsets = [5, 0], sizes = [1, 128], strides = [1, 1]} : vector<8x128xf32> to vector<1x128xf32>
    %21 = vector.broadcast %19 : vector<4x1xf32> to vector<4x128xf32>
    %22 = vector.broadcast %20 : vector<1x128xf32> to vector<4x128xf32>
    %23 = arith.mulf %21, %22 : vector<4x128xf32>
    %24 = arith.addf %18, %23 : vector<4x128xf32>
    %25 = vector.extract_strided_slice %0 {offsets = [0, 16], sizes = [4, 1], strides = [1, 1]} : vector<4x24xf32> to vector<4x1xf32>
    %26 = vector.extract_strided_slice %1 {offsets = [2, 0], sizes = [1, 128], strides = [1, 1]} : vector<8x128xf32> to vector<1x128xf32>
    %27 = vector.broadcast %25 : vector<4x1xf32> to vector<4x128xf32>
    %28 = vector.broadcast %26 : vector<1x128xf32> to vector<4x128xf32>
    %29 = arith.mulf %27, %28 : vector<4x128xf32>
    %30 = arith.addf %24, %29 : vector<4x128xf32>
    %31 = vector.extract_strided_slice %0 {offsets = [0, 17], sizes = [4, 1], strides = [1, 1]} : vector<4x24xf32> to vector<4x1xf32>
    %32 = vector.extract_strided_slice %1 {offsets = [6, 0], sizes = [1, 128], strides = [1, 1]} : vector<8x128xf32> to vector<1x128xf32>
    %33 = vector.broadcast %31 : vector<4x1xf32> to vector<4x128xf32>
    %34 = vector.broadcast %32 : vector<1x128xf32> to vector<4x128xf32>
    %35 = arith.mulf %33, %34 : vector<4x128xf32>
    %36 = arith.addf %30, %35 : vector<4x128xf32>
    %37 = vector.extract_strided_slice %0 {offsets = [0, 22], sizes = [4, 1], strides = [1, 1]} : vector<4x24xf32> to vector<4x1xf32>
    %38 = vector.extract_strided_slice %1 {offsets = [3, 0], sizes = [1, 128], strides = [1, 1]} : vector<8x128xf32> to vector<1x128xf32>
    %39 = vector.broadcast %37 : vector<4x1xf32> to vector<4x128xf32>
    %40 = vector.broadcast %38 : vector<1x128xf32> to vector<4x128xf32>
    %41 = arith.mulf %39, %40 : vector<4x128xf32>
    %42 = arith.addf %36, %41 : vector<4x128xf32>
    %43 = vector.extract_strided_slice %0 {offsets = [0, 23], sizes = [4, 1], strides = [1, 1]} : vector<4x24xf32> to vector<4x1xf32>
    %44 = vector.extract_strided_slice %1 {offsets = [7, 0], sizes = [1, 128], strides = [1, 1]} : vector<8x128xf32> to vector<1x128xf32>
    %45 = vector.broadcast %43 : vector<4x1xf32> to vector<4x128xf32>
    %46 = vector.broadcast %44 : vector<1x128xf32> to vector<4x128xf32>
    %47 = arith.mulf %45, %46 : vector<4x128xf32>
    %48 = arith.addf %42, %47 : vector<4x128xf32>
    %c0_3 = arith.constant 0 : index
    %c0_4 = arith.constant 0 : index
    %49 = vector.load %arg3[%c0_3, %c0_4] : memref<1x128xf32, #tpu.memory_space<vmem>>, vector<1x128xf32>
    %50 = vector.broadcast %49 : vector<1x128xf32> to vector<4x128xf32>
    %51 = arith.addf %48, %50 : vector<4x128xf32>
    %c0_5 = arith.constant 0 : index
    %c0_6 = arith.constant 0 : index
    %52 = vector.load %arg4[%c0_5, %c0_6] : memref<4x128xf32, #tpu.memory_space<vmem>>, vector<4x128xf32>
    tpu.vector_store %arg4[%c0_5, %c0_6], %51 {strides = array<i32>} : memref<4x128xf32, #tpu.memory_space<vmem>>, vector<4x128xf32>,
    return
  }
  func.func @transform_0(%arg0: i32) -> (i32, i32) {
    %c0_i32 = arith.constant 0 : i32
    %c0_i32_0 = arith.constant 0 : i32
    return %arg0, %c0_i32 : i32, i32
  }
  func.func @transform_1(%arg0: i32) -> (i32, i32) {
    %c0_i32 = arith.constant 0 : i32
    %c0_i32_0 = arith.constant 0 : i32
    %c0_i32_1 = arith.constant 0 : i32
    return %c0_i32, %c0_i32_0 : i32, i32
  }
  func.func @transform_2(%arg0: i32) -> (i32, i32) {
    %c0_i32 = arith.constant 0 : i32
    %c0_i32_0 = arith.constant 0 : i32
    %c0_i32_1 = arith.constant 0 : i32
    return %c0_i32, %c0_i32_0 : i32, i32
  }
  func.func @transform_3(%arg0: i32) -> (i32, i32) {
    %c0_i32 = arith.constant 0 : i32
    %c0_i32_0 = arith.constant 0 : i32
    return %arg0, %c0_i32 : i32, i32
  }
}

</mosaic_0001>

<bundles_post_ra>
// kernel: tpu_custom_call.1
= control target key start
LH: loop header
LB: loop body
LE: loop exit
PB: predicated region body
PF: predicated region fallthrough
CT: control target
= control target key end

     0   :  { %8 = vsyncpa [#allocation3], 0  ;;  %s309_s0 = inlined_call_operand.hbm [shape: f32[4,24], index: 0, kind: input, shape index: {}]   ;;  %s310_s1 = inlined_call_operand.hbm [shape: f32[8,128], index: 1, kind: input, shape index: {}]   ;;  %s311_s2 = inlined_call_operand.vmem [shape: f32[1,128], index: 2, kind: input, shape index: {}]   ;;  %s312_s3 = inlined_call_operand.hbm [shape: f32[4,128], index: 3, kind: output, shape index: {}]  }
   0x1   :  { %9 = vsyncpa [#allocation6], 0 }
   0x2   :  { %10 = vsyncpa [#allocation4], 0  ;;  %s239_s12 = smov [#allocation2]   ;;  %s240_s14 = smov [#allocation5]  }
   0x3   :  { %s17_s13 = sshll.u32 %s239_s12, 4  ;;  %s27_s15 = sshll.u32 %s240_s14, 4  ;;  %s18_s13 = int_to_ptr.vmem [resolvable:$true] %s17_s13  ;;  %s28_s15 = int_to_ptr.vmem [resolvable:$true] %s27_s15 }
   0x4   :  { %s167_s18 = scalar_lea.hbm %s309_s0, 64 }
   0x5   :  { %p168_p0 = scmp.ne.s32.totalorder %s309_s0, %s167_s18  ;;  %p171_p1 = scmp.lt.u32.totalorder %s167_s18, %s309_s0 }
   0x7   :  { %p173_p2 = pnand %p171_p1, %p168_p0 }
   0x9   :  { %176 = shalt.err (!%p173_p2)
}
   0xa   :  { %s177_s23 = scalar_lea.vmem %s18_s13, 64  ;;  %p182_p4 = scmp.lt.s32.totalorder %s18_s13, %s18_s13 }
   0xb   :  { %p178_p3 = scmp.ne.s32.totalorder %s18_s13, %s177_s23  ;;  %p183_p5 = scmp.lt.s32.totalorder %s177_s23, %s177_s23 }
   0xd   :  { %p184_p6 = por %p183_p5, %p182_p4 }
   0xf   :  { %p185_p7 = pnand %p184_p6, %p178_p3 }
  0x11   :  { %188 = shalt.err (!%p185_p7)
}
  0x12   :  { %20 = dma.hbm_to_vmem [thread:$0]  %s309_s0, 64, %s18_s13, [#allocation3]  }
  0x13   :  { %s189_s28 = scalar_lea.hbm %s310_s1, 128 }
  0x14   :  { %p190_p8 = scmp.ne.s32.totalorder %s310_s1, %s189_s28  ;;  %p193_p9 = scmp.lt.u32.totalorder %s189_s28, %s310_s1 }
  0x16   :  { %p195_p10 = pnand %p193_p9, %p190_p8 }
  0x18   :  { %198 = shalt.err (!%p195_p10)
}
  0x19   :  { %s199_s6 = scalar_lea.vmem %s28_s15, 128  ;;  %p204_p12 = scmp.lt.s32.totalorder %s28_s15, %s28_s15 }
  0x1a   :  { %p200_p11 = scmp.ne.s32.totalorder %s28_s15, %s199_s6  ;;  %p205_p13 = scmp.lt.s32.totalorder %s199_s6, %s199_s6 }
  0x1c   :  { %p206_p0 = por %p205_p13, %p204_p12 }
  0x1e   :  { %p207_p1 = pnand %p206_p0, %p200_p11 }
  0x20   :  { %210 = shalt.err (!%p207_p1)
}
  0x21   :  { %30 = dma.hbm_to_vmem [thread:$0]  %s310_s1, 128, %s28_s15, [#allocation6]  }
  0x22   :  { %233 = dma.done.wait [#allocation3], 64  }
  0x23   :  { %234 = vsyncadd [#allocation3], 4294967232 }
  0x24   :  { %235 = dma.done.wait [#allocation6], 128  }
  0x25   :  { %236 = vsyncadd [#allocation6], 4294967168  ;;  %v241_v0 = vmov 10   ;;  %v242_v1 = vmov 4   ;;  %v39_v2 = vld [vmem:[#allocation2] sm:$0xf]  ;;  %v46_v9 = vlaneseq }
  0x26   :  { %160 = vset.pattern.permute.xlu1 %v241_v0  ;;  %158 = vset.pattern.permute.xlu0 %v242_v1  ;;  %v243_v3 = vmov 11   ;;  %v244_v4 = vmov 5   ;;  %v245_v5 = vmov 16   ;;  %v246_v6 = vmov 17   ;;  %v40_v16 = vld [vmem:[#allocation5] sm:$0xff]  ;;  %s249_s9 = smov [#allocation7]  }
  0x27   :  { %62 = vperm.xlu1 %160, %v39_v2   ;;  %43 = vperm.xlu0 %158, %v39_v2   ;;  %v247_v7 = vmov 22   ;;  %v248_v8 = vmov 23   ;;  %v47_v10 = vshrl.u32 %v46_v9, 7  ;;  %v146_v50 = vld [vmem:[%s311_s2] ss:$0 sm:$0xff]  ;;  %s136_s10 = sshll.u32 %s249_s9, 4  ;;  %s137_s10 = int_to_ptr.vmem [resolvable:$true] %s136_s10 }
  0x28   :  { %s211_s11 = scalar_lea.vmem %s137_s10, 64  ;;  %p216_p3 = scmp.lt.s32.totalorder %s137_s10, %s137_s10 }
  0x29   :  { %v48_v11 = vsub.s32 0, %v47_v10  ;;  %v57_v12 = vsub.s32 4, %v47_v10  ;;  %v67_v13 = vsub.s32 1, %v47_v10  ;;  %v77_v18 = vsub.s32 5, %v47_v10  ;;  %p212_p2 = scmp.ne.s32.totalorder %s137_s10, %s211_s11  ;;  %p217_p4 = scmp.lt.s32.totalorder %s211_s11, %s211_s11 }
  0x2a   :  { %v87_v20 = vsub.s32 2, %v47_v10  ;;  %v97_v24 = vsub.s32 6, %v47_v10  ;;  %v107_v32 = vsub.s32 3, %v47_v10  ;;  %v117_v41 = vsub.s32 7, %v47_v10 }
  0x2b   :  { %161 = vset.pattern.permute.xlu1 %v243_v3  ;;  %159 = vset.pattern.permute.xlu0 %v244_v4  ;;  %v49_v17 = vrot.slane %v40_v16, %v48_v11  ;;  %v58_v19 = vrot.slane %v40_v16, %v57_v12  ;;  %v68_v21 = vrot.slane %v40_v16, %v67_v13  ;;  %p218_p5 = por %p217_p4, %p216_p3 }
  0x2c   :  { %72 = vperm.xlu1 %161, %v39_v2   ;;  %52 = vperm.xlu0 %159, %v39_v2   ;;  %v78_v26 = vrot.slane %v40_v16, %v77_v18  ;;  %v88_v28 = vrot.slane %v40_v16, %v87_v20  ;;  %v98_v31 = vrot.slane %v40_v16, %v97_v24 }
  0x2d   :  { %v108_v40 = vrot.slane %v40_v16, %v107_v32  ;;  %v118_v46 = vrot.slane %v40_v16, %v117_v41  ;;  %p219_p6 = pnand %p218_p5, %p212_p2 }
  0x30   :  { %162 = vset.pattern.permute.xlu1 %v245_v5  ;;  %163 = vset.pattern.permute.xlu0 %v246_v6 }
  0x31   :  { %82 = vperm.xlu1 %162, %v39_v2   ;;  %92 = vperm.xlu0 %163, %v39_v2  }
  0x35   :  { %164 = vset.pattern.permute.xlu1 %v247_v7  ;;  %166 = vset.pattern.permute.xlu0 %v248_v8 }
  0x36   :  { %102 = vperm.xlu1 %164, %v39_v2  }
  0x3a   :  { %165 = vset.pattern.permute.xlu1 %v248_v8 }
  0x3b   :  { %112 = vperm.xlu1 %165, %v39_v2  }
  0xa6   :  { %v63_v14 = vpop.permute.xlu1 %62  ;;  %v44_v15 = vpop.permute.xlu0 %43 }
  0xa7   :  { %v50_v25 = vmul.f32 %v49_v17, %v44_v15  ;;  %v69_v29 = vmul.f32 %v68_v21, %v63_v14 }
  0xab   :  { %v73_v22 = vpop.permute.xlu1 %72  ;;  %v53_v23 = vpop.permute.xlu0 %52 }
  0xac   :  { %v59_v27 = vmul.f32 %v58_v19, %v53_v23  ;;  %v79_v33 = vmul.f32 %v78_v26, %v73_v22 }
  0xae   :  { %v60_v30 = vadd.f32 %v59_v27, %v50_v25 }
  0xb0   :  { %v70_v34 = vadd.f32 %v69_v29, %v60_v30  ;;  %v83_v35 = vpop.permute.xlu1 %82  ;;  %v93_v36 = vpop.permute.xlu0 %92 }
  0xb1   :  { %v89_v37 = vmul.f32 %v88_v28, %v83_v35  ;;  %v99_v39 = vmul.f32 %v98_v31, %v93_v36 }
  0xb2   :  { %v80_v38 = vadd.f32 %v79_v33, %v70_v34 }
  0xb4   :  { %v90_v42 = vadd.f32 %v89_v37, %v80_v38 }
  0xb5   :  { %v103_v43 = vpop.permute.xlu1 %102 }
  0xb6   :  { %v100_v44 = vadd.f32 %v99_v39, %v90_v42  ;;  %v109_v45 = vmul.f32 %v108_v40, %v103_v43 }
  0xb8   :  { %v110_v48 = vadd.f32 %v109_v45, %v100_v44 }
  0xba   :  { %v113_v47 = vpop.permute.xlu1 %112 }
  0xbb   :  { %v119_v49 = vmul.f32 %v118_v46, %v113_v47 }
  0xbd   :  { %v120_v51 = vadd.f32 %v119_v49, %v110_v48 }
  0xbf   :  { %v128_v52 = vadd.f32 %v146_v50, %v120_v51 }
  0xc1   :  { %129 = vst [vmem:[#allocation7] sm:$0xf] %v128_v52 }
  0xc2   :  { %222 = shalt.err (!%p219_p6)
}
  0xc3   :  { %s223_s14 = scalar_lea.hbm %s312_s3, 64 }
  0xc4   :  { %p224_p7 = scmp.ne.s32.totalorder %s312_s3, %s223_s14  ;;  %p227_p8 = scmp.lt.u32.totalorder %s223_s14, %s312_s3 }
  0xc6   :  { %p229_p9 = pnand %p227_p8, %p224_p7 }
  0xc8   :  { %232 = shalt.err (!%p229_p9)
}
  0xc9   :  { %139 = dma.vmem_to_hbm [thread:$0]  %s137_s10, 64, %s312_s3, [#allocation4]  }
  0xca   :  { %237 = dma.done.wait [#allocation4], 64  }
  0xcb   :  { %238 = vsyncadd [#allocation4], 4294967232 }
  0xcc   :  { %143 = vsyncpa [#allocation3], 1 }
  0xcd   :  { %144 = vsyncpa [#allocation6], 1 }
  0xce   :  { %145 = vsyncpa [#allocation4], 1 }

</bundles_post_ra>
